<compile_context>
chip_gen: v6e
topology: v6e:2x2x1
jax: 0.10.0
libtpu: 0.0.40
codegen_flags: <defaults>
</compile_context>

<pallas_src>
import jax
import jax.numpy as jnp
from jax import lax
from jax.experimental import pallas as pl
from jax.experimental.pallas import tpu as pltpu


def _linear_kernel(x_ref, w_ref, b_ref, o_ref, acc_ref):
    """One (tm, tn) output tile, accumulated over the K (=D) grid axis.

    x_ref : (tm, tk)  activations
    w_ref : (tn, tk)  weights in PyTorch (O, D) layout (transposed contraction)
    b_ref : (1,  tn)  bias slice (lane-dense after padding)
    o_ref : (tm, tn)  output tile
    acc_ref: (tm, tn) f32 accumulator scratch, resident across the K axis
    """
    k = pl.program_id(2)

    @pl.when(k == 0)
    def _():
        acc_ref[...] = jnp.zeros_like(acc_ref)

    # x @ W^T without materializing W^T: contract last axis of both operands.
    acc_ref[...] += lax.dot_general(
        x_ref[...], w_ref[...],
        dimension_numbers=(((1,), (1,)), ((), ())),
        preferred_element_type=jnp.float32,
    )

    @pl.when(k == pl.num_programs(2) - 1)
    def _():
        o_ref[...] = (acc_ref[...] + b_ref[...]).astype(o_ref.dtype)


def _round_up(x, m):
    return ((x + m - 1) // m) * m


def linear_regression_forward(x, weight, bias, *, tm=256, tn=128, tk=512):
    """x: (B, D) f32, weight: (O, D) f32 (PyTorch layout), bias: (O,) f32."""
    B, D = x.shape
    O = weight.shape[0]

    # Pad to TPU-friendly sizes: batch -> sublane multiple (8), D and O ->
    # lane multiples (128) so every tile (and especially the output store
    # path) is lane-dense.
    Bp = _round_up(B, 8)
    Dp = _round_up(D, 128)
    Op = _round_up(O, 128)

    tm = min(tm, Bp)
    tn = min(tn, Op)
    tk = min(tk, Dp)

    # Make padded dims divide evenly by the chosen tiles.
    Bp = _round_up(Bp, tm)
    Dp = _round_up(Dp, tk)
    Op = _round_up(Op, tn)

    xp = x if (Bp == B and Dp == D) else jnp.pad(x, ((0, Bp - B), (0, Dp - D)))
    wp = weight if (Op == O and Dp == D) else jnp.pad(
        weight, ((0, Op - O), (0, Dp - D)))
    bp = bias if Op == O else jnp.pad(bias, (0, Op - O))
    bp = bp.reshape(1, Op)

    grid = (Bp // tm, Op // tn, Dp // tk)

    out = pl.pallas_call(
        _linear_kernel,
        out_shape=jax.ShapeDtypeStruct((Bp, Op), x.dtype),
        grid=grid,
        in_specs=[
            pl.BlockSpec((tm, tk), lambda i, j, k: (i, k)),   # x tile
            pl.BlockSpec((tn, tk), lambda i, j, k: (j, k)),   # weight tile (O,D)
            pl.BlockSpec((1, tn), lambda i, j, k: (0, j)),    # bias slice
        ],
        out_specs=pl.BlockSpec((tm, tn), lambda i, j, k: (i, j)),
        scratch_shapes=[pltpu.VMEM((tm, tn), jnp.float32)],
        compiler_params=pltpu.CompilerParams(
            dimension_semantics=("parallel", "parallel", "arbitrary"),
        ),
    )(xp, wp, bp)

    # Strip the zero padding.
    return out[:B, :O]


if __name__ == "__main__":
    key = jax.random.PRNGKey(0)
    k_x, k_w, k_b = jax.random.split(key, 3)

    # Shapes implied by the module: x (batch, input_size) -> (batch, 1)
    batch = 8
    input_size = 32
    output_size = 1

    x = jax.random.normal(k_x, (batch, input_size), dtype=jnp.float32)

    # Deterministic nn.Linear-style init: U(-1/sqrt(in), 1/sqrt(in))
    bound = 1.0 / (input_size ** 0.5)
    weight = jax.random.uniform(
        k_w, (output_size, input_size), dtype=jnp.float32,
        minval=-bound, maxval=bound)
    bias = jax.random.uniform(
        k_b, (output_size,), dtype=jnp.float32,
        minval=-bound, maxval=bound)

    out = linear_regression_forward(x, weight, bias)
    out = jax.block_until_ready(out)

    # Reference check against plain JAX (same math as torch nn.Linear).
    ref = x @ weight.T + bias
    assert out.shape == (batch, output_size), out.shape
    assert jnp.allclose(out, ref, atol=1e-5, rtol=1e-5)

    print("KERNEL_OK")
</pallas_src>

<mosaic_0001>
module attributes {stable_mosaic.version = 11 : i64} {
  func.func @_linear_kernel(%arg0: i32, %arg1: i32, %arg2: i32, %arg3: memref<8x128xf32, #tpu.memory_space<vmem>>, %arg4: memref<128x128xf32, #tpu.memory_space<vmem>>, %arg5: memref<1x128xf32, #tpu.memory_space<vmem>>, %arg6: memref<8x128xf32, #tpu.memory_space<vmem>>, %arg7: memref<8x128xf32, #tpu.memory_space<vmem>>) attributes {dimension_semantics = [#tpu.dimension_semantics<parallel>, #tpu.dimension_semantics<parallel>, #tpu.dimension_semantics<arbitrary>], iteration_bounds = array<i64: 1, 1, 1>, scalar_prefetch = 0 : i64, scratch_operands = 1 : i64, tpu.core_type = #tpu.core_type<tc>, window_params = [{transform_indices = @transform_0, window_bounds = array<i64: 8, 128>}, {transform_indices = @transform_1, window_bounds = array<i64: 128, 128>}, {transform_indices = @transform_2, window_bounds = array<i64: 1, 128>}, {transform_indices = @transform_3, window_bounds = array<i64: 8, 128>}]} {
    %c0_i32 = arith.constant 0 : i32
    %0 = arith.cmpi eq, %arg2, %c0_i32 : i32
    %1 = arith.extui %0 : i1 to i32
    %c0_i32_0 = arith.constant 0 : i32
    %2 = arith.cmpi ne, %1, %c0_i32_0 : i32
    scf.if %2 {
      %cst_10 = arith.constant 0.000000e+00 : f32
      %12 = vector.broadcast %cst_10 : f32 to vector<8x128xf32>
      %c0_11 = arith.constant 0 : index
      %c0_12 = arith.constant 0 : index
      %13 = vector.load %arg7[%c0_11, %c0_12] : memref<8x128xf32, #tpu.memory_space<vmem>>, vector<8x128xf32>
      tpu.vector_store %arg7[%c0_11, %c0_12], %12 {strides = array<i32>} : memref<8x128xf32, #tpu.memory_space<vmem>>, vector<8x128xf32>,
    } else {
    }
    %c0 = arith.constant 0 : index
    %c0_1 = arith.constant 0 : index
    %3 = vector.load %arg7[%c0, %c0_1] : memref<8x128xf32, #tpu.memory_space<vmem>>, vector<8x128xf32>
    %c0_2 = arith.constant 0 : index
    %c0_3 = arith.constant 0 : index
    %4 = vector.load %arg3[%c0_2, %c0_3] : memref<8x128xf32, #tpu.memory_space<vmem>>, vector<8x128xf32>
    %c0_4 = arith.constant 0 : index
    %c0_5 = arith.constant 0 : index
    %5 = vector.load %arg4[%c0_4, %c0_5] : memref<128x128xf32, #tpu.memory_space<vmem>>, vector<128x128xf32>
    %cst = arith.constant dense<0.000000e+00> : vector<8x128xf32>
    %6 = tpu.matmul %4, %5, %cst {dimension_numbers = #tpu.dot_dimension_numbers<[1], [1], [0], [0], [0, 0, 1, 0], [], []>} : vector<8x128xf32>, vector<128x128xf32>, vector<8x128xf32> -> vector<8x128xf32>
    %7 = arith.addf %3, %6 : vector<8x128xf32>
    %c0_6 = arith.constant 0 : index
    %c0_7 = arith.constant 0 : index
    %8 = vector.load %arg7[%c0_6, %c0_7] : memref<8x128xf32, #tpu.memory_space<vmem>>, vector<8x128xf32>
    tpu.vector_store %arg7[%c0_6, %c0_7], %7 {strides = array<i32>} : memref<8x128xf32, #tpu.memory_space<vmem>>, vector<8x128xf32>,
    %c0_i32_8 = arith.constant 0 : i32
    %9 = arith.cmpi eq, %arg2, %c0_i32_8 : i32
    %10 = arith.extui %9 : i1 to i32
    %c0_i32_9 = arith.constant 0 : i32
    %11 = arith.cmpi ne, %10, %c0_i32_9 : i32
    scf.if %11 {
      %c0_10 = arith.constant 0 : index
      %c0_11 = arith.constant 0 : index
      %12 = vector.load %arg7[%c0_10, %c0_11] : memref<8x128xf32, #tpu.memory_space<vmem>>, vector<8x128xf32>
      %c0_12 = arith.constant 0 : index
      %c0_13 = arith.constant 0 : index
      %13 = vector.load %arg5[%c0_12, %c0_13] : memref<1x128xf32, #tpu.memory_space<vmem>>, vector<1x128xf32>
      %14 = vector.broadcast %13 : vector<1x128xf32> to vector<8x128xf32>
      %15 = arith.addf %12, %14 : vector<8x128xf32>
      %c0_14 = arith.constant 0 : index
      %c0_15 = arith.constant 0 : index
      %16 = vector.load %arg6[%c0_14, %c0_15] : memref<8x128xf32, #tpu.memory_space<vmem>>, vector<8x128xf32>
      tpu.vector_store %arg6[%c0_14, %c0_15], %15 {strides = array<i32>} : memref<8x128xf32, #tpu.memory_space<vmem>>, vector<8x128xf32>,
    } else {
    }
    return
  }
  func.func @transform_0(%arg0: i32, %arg1: i32, %arg2: i32) -> (i32, i32) {
    %c0_i32 = arith.constant 0 : i32
    return %arg0, %arg2 : i32, i32
  }
  func.func @transform_1(%arg0: i32, %arg1: i32, %arg2: i32) -> (i32, i32) {
    %c0_i32 = arith.constant 0 : i32
    return %arg1, %arg2 : i32, i32
  }
  func.func @transform_2(%arg0: i32, %arg1: i32, %arg2: i32) -> (i32, i32) {
    %c0_i32 = arith.constant 0 : i32
    %c0_i32_0 = arith.constant 0 : i32
    return %c0_i32, %arg1 : i32, i32
  }
  func.func @transform_3(%arg0: i32, %arg1: i32, %arg2: i32) -> (i32, i32) {
    %c0_i32 = arith.constant 0 : i32
    return %arg0, %arg1 : i32, i32
  }
}

</mosaic_0001>

<bundles_post_ra>
// kernel: tpu_custom_call.1
= control target key start
LH: loop header
LB: loop body
LE: loop exit
PB: predicated region body
PF: predicated region fallthrough
CT: control target
= control target key end

     0   :  { %8 = vsyncpa [#allocation4], 0  ;;  %s330_s0 = inlined_call_operand.hbm [shape: f32[8,128], index: 0, kind: input, shape index: {}]   ;;  %s331_s1 = inlined_call_operand.hbm [shape: f32[128,128], index: 1, kind: input, shape index: {}]   ;;  %s332_s2 = inlined_call_operand.vmem [shape: f32[1,128], index: 2, kind: input, shape index: {}]   ;;  %s333_s3 = inlined_call_operand.hbm [shape: f32[8,128], index: 3, kind: output, shape index: {}]  }
   0x1   :  { %9 = vsyncpa [#allocation7], 0 }
   0x2   :  { %10 = vsyncpa [#allocation5], 0  ;;  %s291_s12 = smov [#allocation3]   ;;  %s292_s14 = smov [#allocation6]  }
   0x3   :  { %s17_s13 = sshll.u32 %s291_s12, 4  ;;  %s26_s15 = sshll.u32 %s292_s14, 4  ;;  %s18_s13 = int_to_ptr.vmem [resolvable:$true] %s17_s13  ;;  %s27_s15 = int_to_ptr.vmem [resolvable:$true] %s26_s15 }
   0x4   :  { %s233_s16 = scalar_lea.vmem %s18_s13, 128  ;;  %p238_p1 = scmp.lt.s32.totalorder %s18_s13, %s18_s13 }
   0x5   :  { %p234_p0 = scmp.ne.s32.totalorder %s18_s13, %s233_s16  ;;  %p239_p2 = scmp.lt.s32.totalorder %s233_s16, %s233_s16 }
   0x7   :  { %p240_p3 = por %p239_p2, %p238_p1 }
   0x9   :  { %p241_p4 = pnand %p240_p3, %p234_p0 }
   0xb   :  { %244 = shalt.err (!%p241_p4)
}
   0xc   :  { %20 = dma.hbm_to_vmem [thread:$0]  %s330_s0, 128, %s18_s13, [#allocation4]  }
   0xd   :  { %s253_s19 = scalar_lea.vmem %s27_s15, 2048  ;;  %p258_p6 = scmp.lt.s32.totalorder %s27_s15, %s27_s15 }
   0xe   :  { %p254_p5 = scmp.ne.s32.totalorder %s27_s15, %s253_s19  ;;  %p259_p7 = scmp.lt.s32.totalorder %s253_s19, %s253_s19 }
  0x10   :  { %p260_p8 = por %p259_p7, %p258_p6 }
  0x12   :  { %p261_p9 = pnand %p260_p8, %p254_p5 }
  0x14   :  { %264 = shalt.err (!%p261_p9)
}
  0x15   :  { %s293_s20 = smov 128   ;;  %s294_s21 = smov 8  }
  0x16   :  { %32 = dma.hbm_to_vmem [thread:$0]  %s331_s1, 2048, %s27_s15, [#allocation7], %s293_s20, %s293_s20, %s294_s21  }
  0x17   :  { %285 = dma.done.wait [#allocation4], 128  }
  0x18   :  { %286 = vsyncadd [#allocation4], 4294967168 }
  0x19   :  { %287 = dma.done.wait [#allocation7], 2048  }
  0x1a   :  { %288 = vsyncadd [#allocation7], 4294965248  ;;  %v295_v0 = vmov 0.0   ;;  %vm296_vm0 = vmmov 0   ;;  %v63_v1 = vld [vmem:[#allocation6 + $0x78] sm:$0xff]  ;;  %v62_v2 = vld [vmem:[#allocation6 + $0x70] sm:$0xff] }
  0x1b   :  { %183 = vmatprep.subr.mxu0 %v295_v0  ;;  %215 = vmatprep.mubr.msk.f32.mxu0 %vm296_vm0, %v295_v0  ;;  %v61_v3 = vld [vmem:[#allocation6 + $0x68] sm:$0xff]  ;;  %v60_v4 = vld [vmem:[#allocation6 + $0x60] sm:$0xff]  ;;  %v59_v5 = vld [vmem:[#allocation6 + $0x58] sm:$0xff]  ;;  %s297_s24 = smov [#allocation8]  }
  0x1c   :  { %184 = vmatpush3.xpose.msra.mxu0 %v63_v1  ;;  %v58_v6 = vld [vmem:[#allocation6 + $0x50] sm:$0xff]  ;;  %v57_v7 = vld [vmem:[#allocation6 + $0x48] sm:$0xff]  ;;  %v56_v8 = vld [vmem:[#allocation6 + $0x40] sm:$0xff]  ;;  %s155_s25 = sshll.u32 %s297_s24, 4  ;;  %s156_s25 = int_to_ptr.vmem [resolvable:$true] %s155_s25 }
  0x1d   :  { %185 = vmatprep.subr.mxu0 %v295_v0  ;;  %v55_v9 = vld [vmem:[#allocation6 + $0x38] sm:$0xff]  ;;  %v54_v10 = vld [vmem:[#allocation6 + $0x30] sm:$0xff]  ;;  %v53_v11 = vld [vmem:[#allocation6 + $0x28] sm:$0xff]  ;;  %s265_s26 = scalar_lea.vmem %s156_s25, 128  ;;  %p270_p11 = scmp.lt.s32.totalorder %s156_s25, %s156_s25 }
  0x1e   :  { %v52_v12 = vld [vmem:[#allocation6 + $0x20] sm:$0xff]  ;;  %v51_v13 = vld [vmem:[#allocation6 + $0x18] sm:$0xff]  ;;  %v50_v14 = vld [vmem:[#allocation6 + $0x10] sm:$0xff]  ;;  %p266_p10 = scmp.ne.s32.totalorder %s156_s25, %s265_s26  ;;  %p271_p12 = scmp.lt.s32.totalorder %s265_s26, %s265_s26 }
  0x1f   :  { %v49_v15 = vld [vmem:[#allocation6 + $0x8] sm:$0xff]  ;;  %v48_v16 = vld [vmem:[#allocation6] sm:$0xff]  ;;  %v47_v17 = vld [vmem:[#allocation3] sm:$0xff] }
  0x20   :  { %186 = vmatpush3.xpose.msra.mxu0 %v62_v2  ;;  %v165_v18 = vld [vmem:[%s332_s2] ss:$0 sm:$0xff]  ;;  %p272_p13 = por %p271_p12, %p270_p11 }
  0x21   :  { %187 = vmatprep.subr.mxu0 %v295_v0 }
  0x22   :  { %p273_p0 = pnand %p272_p13, %p266_p10 }
  0x24   :  { %188 = vmatpush3.xpose.msra.mxu0 %v61_v3 }
  0x25   :  { %189 = vmatprep.subr.mxu0 %v295_v0 }
  0x28   :  { %190 = vmatpush3.xpose.msra.mxu0 %v60_v4 }
  0x29   :  { %191 = vmatprep.subr.mxu0 %v295_v0 }
  0x2c   :  { %192 = vmatpush3.xpose.msra.mxu0 %v59_v5 }
  0x2d   :  { %193 = vmatprep.subr.mxu0 %v295_v0 }
  0x30   :  { %194 = vmatpush3.xpose.msra.mxu0 %v58_v6 }
  0x31   :  { %195 = vmatprep.subr.mxu0 %v295_v0 }
  0x34   :  { %196 = vmatpush3.xpose.msra.mxu0 %v57_v7 }
  0x35   :  { %197 = vmatprep.subr.mxu0 %v295_v0 }
  0x38   :  { %198 = vmatpush3.xpose.msra.mxu0 %v56_v8 }
  0x39   :  { %199 = vmatprep.subr.mxu0 %v295_v0 }
  0x3c   :  { %200 = vmatpush3.xpose.msra.mxu0 %v55_v9 }
  0x3d   :  { %201 = vmatprep.subr.mxu0 %v295_v0 }
  0x40   :  { %202 = vmatpush3.xpose.msra.mxu0 %v54_v10 }
  0x41   :  { %203 = vmatprep.subr.mxu0 %v295_v0 }
  0x44   :  { %204 = vmatpush3.xpose.msra.mxu0 %v53_v11 }
  0x45   :  { %205 = vmatprep.subr.mxu0 %v295_v0 }
  0x48   :  { %206 = vmatpush3.xpose.msra.mxu0 %v52_v12 }
  0x49   :  { %207 = vmatprep.subr.mxu0 %v295_v0 }
  0x4c   :  { %208 = vmatpush3.xpose.msra.mxu0 %v51_v13 }
  0x4d   :  { %209 = vmatprep.subr.mxu0 %v295_v0 }
  0x50   :  { %210 = vmatpush3.xpose.msra.mxu0 %v50_v14 }
  0x51   :  { %211 = vmatprep.subr.mxu0 %v295_v0 }
  0x54   :  { %212 = vmatpush3.xpose.msra.mxu0 %v49_v15 }
  0x55   :  { %213 = vmatprep.subr.mxu0 %v295_v0 }
  0x58   :  { %214 = vmatpush3.xpose.msra.mxu0 %v48_v16 }
  0x5b   :  { %216 = vmatmul.mubr.f32.vlgmr.msra.gmra.mxu0 %v47_v17 }
 0x11b   :  { %v130_v19 = vpop.f32.mrf.mxu0 }
 0x11c   :  { %v147_v20 = vadd.f32 %v165_v18, %v130_v19 }
 0x11d   :  { %v217_v21 = vpop.f32.mrf.mxu0 }
 0x11e   :  { %148 = vst [vmem:[#allocation8] sm:$0xff] %v147_v20 }
 0x11f   :  { %276 = shalt.err (!%p273_p0)
}
 0x120   :  { %158 = dma.vmem_to_hbm [thread:$0]  %s156_s25, 128, %s333_s3, [#allocation5]  }
 0x121   :  { %289 = dma.done.wait [#allocation5], 128  }
 0x122   :  { %290 = vsyncadd [#allocation5], 4294967168 }
 0x123   :  { %162 = vsyncpa [#allocation4], 1 }
 0x124   :  { %163 = vsyncpa [#allocation7], 1 }
 0x125   :  { %164 = vsyncpa [#allocation5], 1 }

</bundles_post_ra>
